<compile_context>
chip_gen: v5e
topology: v5e:2x2
jax: 0.10.0
libtpu: 0.0.40
codegen_flags: <defaults>
</compile_context>

<pallas_src>
import functools

import jax
import jax.numpy as jnp
from jax.experimental import pallas as pl
from jax.experimental.pallas import tpu as pltpu


def _layernorm_kernel(x_ref, g_ref, b_ref, o_ref, *, eps):
    # x_ref block: (1, C, T)  ->  work on the (C, T) slab.
    x = x_ref[0].astype(jnp.float32)
    mean = jnp.mean(x, axis=0, keepdims=True)                  # (1, T)
    var = jnp.mean((x - mean) ** 2, axis=0, keepdims=True)     # biased variance
    y = (x - mean) / (jnp.sqrt(var) + eps)                     # (std + eps), as in the module
    y = y * g_ref[...] + b_ref[...]                            # (C,1) broadcast over lanes
    o_ref[0] = y.astype(o_ref.dtype)


def _pick_spatial_tile(hw, max_tile=2048):
    """Largest lane-dense (multiple-of-128) tile that evenly divides hw."""
    if hw % 128 != 0:
        return hw                       # full-extent block is always legal
    t = min(hw, max_tile)
    while hw % t:
        t -= 128
    return t


def layer_norm(x_nchw, g, b, *, eps=1e-5):
    """Channel LayerNorm on NCHW input.  g, b have PyTorch param shape (1, C, 1, 1)."""
    B, C, H, W = x_nchw.shape
    HW = H * W
    T = _pick_spatial_tile(HW)

    x3 = x_nchw.reshape(B, C, HW)                 # free reshape, no transpose
    g2 = g.reshape(C, 1).astype(jnp.float32)
    b2 = b.reshape(C, 1).astype(jnp.float32)

    kernel = functools.partial(_layernorm_kernel, eps=eps)
    out = pl.pallas_call(
        kernel,
        out_shape=jax.ShapeDtypeStruct((B, C, HW), x_nchw.dtype),
        grid=(B, HW // T),
        in_specs=[
            pl.BlockSpec((1, C, T), lambda i, j: (i, 0, j)),
            pl.BlockSpec((C, 1), lambda i, j: (0, 0)),
            pl.BlockSpec((C, 1), lambda i, j: (0, 0)),
        ],
        out_specs=pl.BlockSpec((1, C, T), lambda i, j: (i, 0, j)),
        compiler_params=pltpu.CompilerParams(
            dimension_semantics=("parallel", "parallel")),
    )(x3, g2, b2)
    return out.reshape(B, C, H, W)


# ---------------- pure-JAX reference for validation ----------------
def _ref_layer_norm(x, g, b, eps=1e-5):
    mean = jnp.mean(x, axis=1, keepdims=True)
    var = jnp.mean((x - mean) ** 2, axis=1, keepdims=True)
    return (x - mean) / (jnp.sqrt(var) + eps) * g + b


if __name__ == "__main__":
    B, C, H, W = 2, 32, 16, 16        # H*W = 256 -> fully lane-dense blocks

    key = jax.random.PRNGKey(0)
    kx, kg, kb = jax.random.split(key, 3)
    x = jax.random.normal(kx, (B, C, H, W), jnp.float32)
    # Module defaults are g=1, b=0; use non-trivial values to exercise the affine part.
    g = 1.0 + 0.1 * jax.random.normal(kg, (1, C, 1, 1), jnp.float32)
    b = 0.1 * jax.random.normal(kb, (1, C, 1, 1), jnp.float32)

    out = jax.block_until_ready(layer_norm(x, g, b))
    ref = _ref_layer_norm(x, g, b)

    assert out.shape == (B, C, H, W)
    assert jnp.allclose(out, ref, atol=1e-5, rtol=1e-5), "mismatch vs pure-JAX reference"

    print("KERNEL_OK")
</pallas_src>

<mosaic_0001>
module attributes {stable_mosaic.version = 11 : i64} {
  func.func @_layernorm_kernel(%arg0: i32, %arg1: i32, %arg2: memref<1x32x256xf32, #tpu.memory_space<vmem>>, %arg3: memref<32x1xf32, #tpu.memory_space<vmem>>, %arg4: memref<32x1xf32, #tpu.memory_space<vmem>>, %arg5: memref<1x32x256xf32, #tpu.memory_space<vmem>>) attributes {dimension_semantics = [#tpu.dimension_semantics<parallel>, #tpu.dimension_semantics<parallel>], iteration_bounds = array<i64: 2, 1>, scalar_prefetch = 0 : i64, scratch_operands = 0 : i64, tpu.core_type = #tpu.core_type<tc>, window_params = [{transform_indices = @transform_0, window_bounds = array<i64: 1, 32, 256>}, {pipeline_mode = #tpu.pipeline_mode<synchronous>, transform_indices = @transform_1, window_bounds = array<i64: 32, 1>}, {pipeline_mode = #tpu.pipeline_mode<synchronous>, transform_indices = @transform_2, window_bounds = array<i64: 32, 1>}, {transform_indices = @transform_3, window_bounds = array<i64: 1, 32, 256>}]} {
    %c0 = arith.constant 0 : index
    %c0_0 = arith.constant 0 : index
    %c0_1 = arith.constant 0 : index
    %0 = vector.load %arg2[%c0, %c0_0, %c0_1] : memref<1x32x256xf32, #tpu.memory_space<vmem>>, vector<1x32x256xf32>
    %1 = vector.shape_cast %0 : vector<1x32x256xf32> to vector<32x256xf32>
    %cst = arith.constant dense<0.000000e+00> : vector<256xf32>
    %2 = vector.multi_reduction <add>, %1, %cst [0] : vector<32x256xf32> to vector<256xf32>
    %3 = vector.shape_cast %2 : vector<256xf32> to vector<1x256xf32>
    %cst_2 = arith.constant 3.200000e+01 : f32
    %4 = vector.broadcast %cst_2 : f32 to vector<1x256xf32>
    %5 = arith.divf %3, %4 : vector<1x256xf32>
    %6 = vector.broadcast %5 : vector<1x256xf32> to vector<32x256xf32>
    %7 = arith.subf %1, %6 : vector<32x256xf32>
    %8 = arith.mulf %7, %7 : vector<32x256xf32>
    %cst_3 = arith.constant dense<0.000000e+00> : vector<256xf32>
    %9 = vector.multi_reduction <add>, %8, %cst_3 [0] : vector<32x256xf32> to vector<256xf32>
    %10 = vector.shape_cast %9 : vector<256xf32> to vector<1x256xf32>
    %cst_4 = arith.constant 3.200000e+01 : f32
    %11 = vector.broadcast %cst_4 : f32 to vector<1x256xf32>
    %12 = arith.divf %10, %11 : vector<1x256xf32>
    %13 = vector.broadcast %5 : vector<1x256xf32> to vector<32x256xf32>
    %14 = arith.subf %1, %13 : vector<32x256xf32>
    %15 = math.sqrt %12 : vector<1x256xf32>
    %cst_5 = arith.constant 9.99999974E-6 : f32
    %16 = vector.broadcast %cst_5 : f32 to vector<1x256xf32>
    %17 = arith.addf %15, %16 : vector<1x256xf32>
    %18 = vector.broadcast %17 : vector<1x256xf32> to vector<32x256xf32>
    %19 = arith.divf %14, %18 : vector<32x256xf32>
    %c0_6 = arith.constant 0 : index
    %c0_7 = arith.constant 0 : index
    %20 = vector.load %arg3[%c0_6, %c0_7] : memref<32x1xf32, #tpu.memory_space<vmem>>, vector<32x1xf32>
    %21 = vector.broadcast %20 : vector<32x1xf32> to vector<32x256xf32>
    %22 = arith.mulf %19, %21 : vector<32x256xf32>
    %c0_8 = arith.constant 0 : index
    %c0_9 = arith.constant 0 : index
    %23 = vector.load %arg4[%c0_8, %c0_9] : memref<32x1xf32, #tpu.memory_space<vmem>>, vector<32x1xf32>
    %24 = vector.broadcast %23 : vector<32x1xf32> to vector<32x256xf32>
    %25 = arith.addf %22, %24 : vector<32x256xf32>
    %c0_10 = arith.constant 0 : index
    %c0_11 = arith.constant 0 : index
    %c0_12 = arith.constant 0 : index
    %26 = vector.load %arg5[%c0_10, %c0_11, %c0_12] : memref<1x32x256xf32, #tpu.memory_space<vmem>>, vector<1x32x256xf32>
    %27 = vector.shape_cast %26 : vector<1x32x256xf32> to vector<32x256xf32>
    %28 = vector.shape_cast %25 : vector<32x256xf32> to vector<1x32x256xf32>
    tpu.vector_store %arg5[%c0_10, %c0_11, %c0_12], %28 {strides = array<i32>} : memref<1x32x256xf32, #tpu.memory_space<vmem>>, vector<1x32x256xf32>,
    return
  }
  func.func @transform_0(%arg0: i32, %arg1: i32) -> (i32, i32, i32) {
    %c0_i32 = arith.constant 0 : i32
    %c0_i32_0 = arith.constant 0 : i32
    return %arg0, %c0_i32, %arg1 : i32, i32, i32
  }
  func.func @transform_1(%arg0: i32, %arg1: i32) -> (i32, i32) {
    %c0_i32 = arith.constant 0 : i32
    %c0_i32_0 = arith.constant 0 : i32
    %c0_i32_1 = arith.constant 0 : i32
    return %c0_i32, %c0_i32_0 : i32, i32
  }
  func.func @transform_2(%arg0: i32, %arg1: i32) -> (i32, i32) {
    %c0_i32 = arith.constant 0 : i32
    %c0_i32_0 = arith.constant 0 : i32
    %c0_i32_1 = arith.constant 0 : i32
    return %c0_i32, %c0_i32_0 : i32, i32
  }
  func.func @transform_3(%arg0: i32, %arg1: i32) -> (i32, i32, i32) {
    %c0_i32 = arith.constant 0 : i32
    %c0_i32_0 = arith.constant 0 : i32
    return %arg0, %c0_i32, %arg1 : i32, i32, i32
  }
}

</mosaic_0001>

<bundles_post_ra>
// kernel: tpu_custom_call.1
= control target key start
LH: loop header
LB: loop body
LE: loop exit
PB: predicated region body
PF: predicated region fallthrough
CT: control target
= control target key end

     0   :  { %8 = vsyncpa [#allocation3], 0  ;;  %s958_s0 = inlined_call_operand.hbm [shape: f32[2,32,256], index: 0, kind: input, shape index: {}]   ;;  %s959_s1 = inlined_call_operand.vmem [shape: f32[32,1], index: 1, kind: input, shape index: {}]   ;;  %s960_s2 = inlined_call_operand.vmem [shape: f32[32,1], index: 2, kind: input, shape index: {}]   ;;  %s961_s3 = inlined_call_operand.hbm [shape: f32[2,32,256], index: 3, kind: output, shape index: {}]  }
   0x1   :  { %10 = vsyncpa [#allocation3 + $0x1], 0 }
   0x2   :  { %11 = vsyncpa [#allocation4], 0 }
   0x3   :  { %13 = vsyncpa [#allocation4 + $0x1], 0  ;;  %s759_s12 = smov 0   ;;  %s761_s13 = smov 0  }
   0x4   :  { %s763_s14 = smov 0   ;;  %s765_s15 = smov 0  }
   0x5   :  { %s767_s16 = smov 0   ;;  %s769_s17 = smov 0  }
   0x6 LB: > { %s521_s18 = sadd.s32 4294967295, %s731_s17   ;;  %s522_s19 = sadd.s32 4294967294, %s731_s17   ;;  %s731_s17 = sphi %s769_s17, %s19_s17   ;;  %s727_s16 = sphi %s767_s16, %s970_s16   ;;  %s723_s15 = sphi %s765_s15, %s969_s15   ;;  %s719_s14 = sphi %s763_s14, %s968_s14   ;;  %s715_s13 = sphi %s761_s13, %s967_s13   ;;  %s711_s12 = sphi %s759_s12, %s966_s12  }
   0x7   : > { %s31_s20 = sadd.s32 1, %s727_s16  ;;  %s40_s21 = sadd.s32 1, %s719_s14 }
   0x8   : > { %p33_p0 = scmp.ge.s32.totalorder %s31_s20, 2  ;;  %p47_p1 = scmp.ne.s32.totalorder %s719_s14, %s715_s13 }
   0x9   : > { %p48_p2 = scmp.eq.s32.totalorder %s731_s17, 0  ;;  %p53_p3 = scmp.ne.s32.totalorder %s715_s13, %s711_s12 }
   0xa   : > { %s972_s20 = smov (%p33_p0, %s31_s20), 0  ;;  %p54_p5 = scmp.eq.s32.totalorder %s521_s18, 0 }
   0xb   : > { %p800_p4 = por %p48_p2, %p47_p1  ;;  %s35_s23 = ssub.s32 %s727_s16, %s972_s20 }
   0xc   : > { %p121_p6 = scmp.eq.s32.totalorder %s521_s18, 1  ;;  %p38_p7 = scmp.eq.s32.totalorder %s35_s23, 0 }
   0xd   : > { %p806_p8 = por %p54_p5, %p53_p3  ;;  %p127_p10 = scmp.eq.s32.totalorder %s522_s19, 1 }
   0xe   : > { %p810_p9 = por %p121_p6, %p47_p1  ;;  %p524_p12 = scmp.ge.s32.totalorder %s731_s17, 2 }
   0xf   : > { %s815_s26 = scalar_select %p38_p7, %s719_s14, %s40_s21  }
  0x10   : > { %p817_p11 = por %p127_p10, %p53_p3  ;;  %p550_p13 = scmp.lt.s32.totalorder %s731_s17, 2 }
  0x11   : > { %s153_s28 = sand.u32 1, %s719_s14   ;;  %s536_s30 = sshll.u32 %s727_s16, 6 }
  0x12   : > { %s525_s29 = sshll.u32 %s153_s28, 6  ;;  %s164_s6 = scalar_lea.hbm %s958_s0, %s536_s30 }
  0x13   : > { %s157_s7 = scalar_lea.vmem [#allocation2], %s525_s29  ;;  %s165_s9 = sshll.u32 %s164_s6, 4  ;;  %s166_s9 = int_to_ptr.hbm [resolvable:$true] %s165_s9 }
  0x14   : > { %s167_s8 = sshll.u32 %s157_s7, 4  ;;  %p543_p0 = pnand %p550_p13, %p800_p4  ;;  %s168_s8 = int_to_ptr.vmem [resolvable:$true] %s167_s8 }
  0x15   : > { %p528_p1 = scmp.ge.s32.totalorder %s731_s17, 1  ;;  %s154_s10 = scalar_lea.sflag [#allocation3], %s153_s28 }
  0x16   : > { %s733_s11 = smov 256   ;;  %s734_s18 = smov 16  }
  0x17   : > { %545 = dma.hbm_to_vmem [thread:$0]  (!%p543_p0), %s166_s9, 1024, %s168_s8, %s154_s10, %s733_s11, %s733_s11, %s734_s18  }
  0x18   : > { %p175_p2 = scmp.lt.s32.totalorder %s731_s17, 3 }
  0x1a   : > { %p176_p3 = pnand %p528_p1, %p175_p2 }
  0x1b   : > { %s833_s19 = sand.u32 (!%p176_p3), 1, %s715_s13  }
  0x1c   : > { %179 = sbr.rel (%p176_p3) target bundleno = 176 (0xb0), region = 32  ;;  %s529_s21 = sshll.u32 (!%p176_p3), %s833_s19, 6 }
  0x1d   : > { %s182_s23 = scalar_lea.sflag (!%p176_p3), [#allocation3], %s833_s19  ;;  %s185_s22 = scalar_lea.vmem (!%p176_p3), [#allocation2], %s529_s21 }
  0x21   : > { %702 = dma.done.wait (%p806_p8), %s182_s23, 1024  }
  0x22   : > { %704 = vsyncadd (%p806_p8), %s182_s23, 4294966272  ;;  %v735_v0 = vmov 0   ;;  %v346_v1 = vld [vmem:[%s959_s1 + $0x10] sm:$0xff]  ;;  %v344_v2 = vld [vmem:[%s959_s1] sm:$0xff]  ;;  %v736_v3 = vmov 32.0   ;;  %s903_s29 = scalar_lea.vmem [#allocation5], %s529_s21 }
  0x23   : > { %607 = vset.pattern.permute.xlu1 %v735_v0  ;;  %606 = vset.pattern.permute.xlu0 %v735_v0  ;;  %609 = vrcp.f32 %v736_v3  ;;  %v376_v4 = vld [vmem:[%s960_s2] sm:$0xff]  ;;  %v212_v6 = vld [vmem:[%s185_s22 + $0x8] sm:$0xff]  ;;  %v213_v7 = vld [vmem:[%s185_s22 + $0x10] sm:$0xff]  ;;  %s537_s21 = sshll.u32 %s723_s15, 6  ;;  %s431_s15 = sshll.u32 %s903_s29, 4  ;;  %s432_s15 = int_to_ptr.vmem [resolvable:$true] %s431_s15 }
  0x24   : > { %608 = vset.pattern.permute.xlu2 %v735_v0  ;;  %360 = vperm.xlu1 %607, %v346_v1   ;;  %v211_v5 = vld [vmem:[%s185_s22] sm:$0xff]  ;;  %v214_v8 = vld [vmem:[%s185_s22 + $0x18] sm:$0xff]  ;;  %v216_v10 = vld [vmem:[%s185_s22 + $0x28] sm:$0xff]  ;;  %s430_s5 = scalar_lea.hbm %s961_s3, %s537_s21  ;;  %s417_s24 = scalar_lea.sflag [#allocation4], %s833_s19 }
  0x25   : > { %350 = vperm.xlu0 %606, %v344_v2   ;;  %382 = vperm.xlu2 %608, %v376_v4   ;;  %v215_v9 = vld [vmem:[%s185_s22 + $0x20] sm:$0xff]  ;;  %v219_v11 = vadd.f32 %v213_v7, %v211_v5  ;;  %v228_v12 = vadd.f32 %v214_v8, %v212_v6  ;;  %v217_v13 = vld [vmem:[%s185_s22 + $0x30] sm:$0xff]  ;;  %v218_v14 = vld [vmem:[%s185_s22 + $0x38] sm:$0xff]  ;;  %s433_s6 = sshll.u32 %s430_s5, 4  ;;  %s669_s11 = scalar_lea.hbm %s961_s3, 128  ;;  %s434_s6 = int_to_ptr.hbm [resolvable:$true] %s433_s6 }
  0x26   : > { %v347_v16 = vld [vmem:[%s959_s1 + $0x18] sm:$0xff]  ;;  %v345_v17 = vld [vmem:[%s959_s1 + $0x8] sm:$0xff]  ;;  %v378_v31 = vld [vmem:[%s960_s2 + $0x10] sm:$0xff]  ;;  %s663_s7 = sshra.s32 %s434_s6, 4  ;;  %s664_s7 = int_to_ptr.hbm [resolvable:$true] %s663_s7 }
  0x27   : > { %v220_v18 = vadd.f32 %v219_v11, %v215_v9  ;;  %v229_v19 = vadd.f32 %v228_v12, %v216_v10  ;;  %v377_v21 = vld [vmem:[%s960_s2 + $0x8] sm:$0xff]  ;;  %v379_v30 = vld [vmem:[%s960_s2 + $0x18] sm:$0xff]  ;;  %s665_s8 = scalar_lea.hbm %s664_s7, 64  ;;  %p670_p7 = scmp.lt.s32.totalorder %s664_s7, %s961_s3 }
  0x28   : > { %p666_p4 = scmp.ne.s32.totalorder %s664_s7, %s665_s8  ;;  %p671_p8 = scmp.lt.s32.totalorder %s669_s11, %s665_s8 }
  0x29   : > { %v610_v15 = vpop.eup %609  ;;  %v221_v22 = vadd.f32 %v220_v18, %v217_v13  ;;  %v230_v23 = vadd.f32 %v229_v19, %v218_v14 }
  0x2a   : > { %v238_v20 = vmul.f32 32.0, %v610_v15  ;;  %vm242_vm0 = vweird.f32 %v610_v15  ;;  %p667_p5 = pnand %p666_p4, %p810_p9  ;;  %p672_p10 = por %p671_p8, %p670_p7 }
  0x2b   : > { %v222_v25 = vrot.slane %v221_v22, 4  ;;  %v231_v26 = vrot.slane %v230_v23, 4 }
  0x2c   : > { %365 = vperm.xlu1 %607, %v347_v16   ;;  %v239_v24 = vsub.f32 1.0, %v238_v20  ;;  %p668_p6 = pneg %p667_p5 }
  0x2d   : > { %355 = vperm.xlu0 %606, %v345_v17   ;;  %387 = vperm.xlu2 %608, %v377_v21   ;;  %v223_v28 = vadd.f32 %v222_v25, %v221_v22  ;;  %v232_v29 = vadd.f32 %v231_v26, %v230_v23 }
  0x2e   : > { %v240_v27 = vmul.f32 %v610_v15, %v239_v24  ;;  %p673_p13 = pnand %p672_p10, %p668_p6 }
  0x2f   : > { %v224_v32 = vrot.slane %v223_v28, 2  ;;  %v233_v33 = vrot.slane %v232_v29, 2 }
  0x30   : > { %v241_v34 = vadd.f32 %v610_v15, %v240_v27 }
  0x31   : > { %v225_v35 = vadd.f32 %v224_v32, %v223_v28  ;;  %v234_v36 = vadd.f32 %v233_v33, %v232_v29 }
  0x32   : > { %v243_v39 = vsel %vm242_vm0, %v610_v15, %v241_v34 }
  0x33   : > { %v226_v37 = vrot.slane %v225_v35, 1  ;;  %v235_v38 = vrot.slane %v234_v36, 1 }
  0x34   : > { %397 = vperm.xlu1 %607, %v379_v30  }
  0x35   : > { %392 = vperm.xlu0 %606, %v378_v31   ;;  %v227_v40 = vadd.f32 %v226_v37, %v225_v35  ;;  %v236_v41 = vadd.f32 %v235_v38, %v234_v36 }
  0x37   : > { %v244_v42 = vmul.f32 %v243_v39, %v227_v40  ;;  %v245_v43 = vmul.f32 %v243_v39, %v236_v41 }
  0x39   : > { %v867_v44 = vsub.f32 %v211_v5, %v244_v42  ;;  %v869_v45 = vsub.f32 %v212_v6, %v245_v43  ;;  %v871_v46 = vsub.f32 %v213_v7, %v244_v42  ;;  %v873_v47 = vsub.f32 %v214_v8, %v245_v43 }
  0x3a   : > { %v875_v48 = vsub.f32 %v215_v9, %v244_v42  ;;  %v877_v49 = vsub.f32 %v216_v10, %v245_v43  ;;  %v879_v50 = vsub.f32 %v217_v13, %v244_v42  ;;  %v881_v51 = vsub.f32 %v218_v14, %v245_v43 }
  0x3b   : > { %v254_v52 = vmul.f32 %v867_v44, %v867_v44  ;;  %v255_v53 = vmul.f32 %v869_v45, %v869_v45  ;;  %v256_v54 = vmul.f32 %v871_v46, %v871_v46  ;;  %v257_v55 = vmul.f32 %v873_v47, %v873_v47 }
  0x3c   : > { %v258_v56 = vmul.f32 %v875_v48, %v875_v48  ;;  %v259_v57 = vmul.f32 %v877_v49, %v877_v49  ;;  %v260_v58 = vmul.f32 %v879_v50, %v879_v50  ;;  %v261_v59 = vmul.f32 %v881_v51, %v881_v51 }
  0x3d   : > { %v262_v60 = vadd.f32 %v256_v54, %v254_v52  ;;  %v271_v61 = vadd.f32 %v257_v55, %v255_v53 }
  0x3f   : > { %v263_v62 = vadd.f32 %v262_v60, %v258_v56  ;;  %v272_v63 = vadd.f32 %v271_v61, %v259_v57 }
  0x41   : > { %v264_v0 = vadd.f32 %v263_v62, %v260_v58  ;;  %v273_v1 = vadd.f32 %v272_v63, %v261_v59 }
  0x43   : > { %v265_v2 = vrot.slane %v264_v0, 4  ;;  %v274_v3 = vrot.slane %v273_v1, 4 }
  0x45   : > { %v266_v4 = vadd.f32 %v265_v2, %v264_v0  ;;  %v275_v5 = vadd.f32 %v274_v3, %v273_v1 }
  0x47   : > { %v267_v6 = vrot.slane %v266_v4, 2  ;;  %v276_v7 = vrot.slane %v275_v5, 2 }
  0x49   : > { %v268_v8 = vadd.f32 %v267_v6, %v266_v4  ;;  %v277_v9 = vadd.f32 %v276_v7, %v275_v5 }
  0x4b   : > { %v269_v10 = vrot.slane %v268_v8, 1  ;;  %v278_v11 = vrot.slane %v277_v9, 1 }
  0x4d   : > { %v270_v12 = vadd.f32 %v269_v10, %v268_v8  ;;  %v279_v13 = vadd.f32 %v278_v11, %v277_v9 }
  0x4f   : > { %v280_v14 = vmul.f32 %v270_v12, %v243_v39  ;;  %v281_v15 = vmul.f32 %v279_v13, %v243_v39 }
  0x51   : > { %611 = vrsqrt.f32 %v280_v14  ;;  %vm289_vm1 = vcmp.eq.f32.partialorder %v280_v14, inf  ;;  %vm301_vm2 = vcmp.eq.f32.partialorder %v281_v15, inf  ;;  %v292_v30 = vand.u32 2147483648, %v280_v14 }
  0x52   : > { %613 = vrsqrt.f32 %v281_v15  ;;  %vm291_vm3 = vcmp.eq.f32.partialorder %v280_v14, 0.0  ;;  %v304_v32 = vand.u32 2147483648, %v281_v15  ;;  %vm303_vm4 = vcmp.eq.f32.partialorder %v281_v15, 0.0 }
  0x57   : > { %v612_v16 = vpop.eup %611 }
  0x58   : > { %v614_v17 = vpop.eup %613  ;;  %v283_v18 = vmul.f32 %v612_v16, %v280_v14 }
  0x59   : > { %v295_v19 = vmul.f32 %v614_v17, %v281_v15 }
  0x5a   : > { %v284_v20 = vmul.f32 %v612_v16, %v283_v18 }
  0x5b   : > { %v296_v21 = vmul.f32 %v614_v17, %v295_v19 }
  0x5c   : > { %v285_v22 = vmul.f32 0.5, %v284_v20 }
  0x5d   : > { %v297_v23 = vmul.f32 0.5, %v296_v21 }
  0x5e   : > { %v286_v24 = vsub.f32 1.5, %v285_v22 }
  0x5f   : > { %v298_v25 = vsub.f32 1.5, %v297_v23 }
  0x60   : > { %v287_v26 = vmul.f32 %v612_v16, %v286_v24 }
  0x61   : > { %v299_v27 = vmul.f32 %v614_v17, %v298_v25 }
  0x62   : > { %v288_v28 = vmul.f32 %v287_v26, %v280_v14 }
  0x63   : > { %v300_v29 = vmul.f32 %v299_v27, %v281_v15 }
  0x64   : > { %v290_v31 = vsel %vm289_vm1, %v280_v14, %v288_v28 }
  0x65   : > { %v302_v33 = vsel %vm301_vm2, %v281_v15, %v300_v29  ;;  %v293_v34 = vsel %vm291_vm3, %v292_v30, %v290_v31 }
  0x66   : > { %v305_v35 = vsel %vm303_vm4, %v304_v32, %v302_v33  ;;  %v306_v36 = vadd.f32 1e-05, %v293_v34 }
  0x67   : > { %v307_v37 = vadd.f32 1e-05, %v305_v35 }
  0x68   : > { %615 = vrcp.f32 %v306_v36  ;;  %vm313_vm5 = vweird.f32 %v306_v36  ;;  %v319_v54 = vand.u32 2147483648, %v306_v36  ;;  %v317_v57 = vand.u32 2147483647, %v306_v36 }
  0x69   : > { %617 = vrcp.f32 %v307_v37  ;;  %vm328_vm7 = vweird.f32 %v307_v37  ;;  %v334_v55 = vand.u32 2147483648, %v307_v37  ;;  %v332_v59 = vand.u32 2147483647, %v307_v37 }
  0x6a   : > { %v320_v60 = vor.u32 1.1754944e-38, %v319_v54  ;;  %vm318_vm11 = vcmp.eq.f32.partialorder %v317_v57, 8.507059e+37 }
  0x6b   : > { %v335_v61 = vor.u32 1.1754944e-38, %v334_v55  ;;  %vm333_vm12 = vcmp.eq.f32.partialorder %v332_v59, 8.507059e+37 }
  0x6e   : > { %v616_v38 = vpop.eup %615 }
  0x6f   : > { %v618_v39 = vpop.eup %617  ;;  %v309_v40 = vmul.f32 %v616_v38, %v306_v36  ;;  %vm314_vm6 = vweird.f32 %v616_v38 }
  0x70   : > { %v324_v41 = vmul.f32 %v618_v39, %v307_v37  ;;  %vm329_vm8 = vweird.f32 %v618_v39  ;;  %vm315_vm9 = vmor %vm313_vm5, %vm314_vm6 }
  0x71   : > { %v310_v42 = vsub.f32 1.0, %v309_v40  ;;  %vm330_vm10 = vmor %vm328_vm7, %vm329_vm8 }
  0x72   : > { %v325_v43 = vsub.f32 1.0, %v324_v41 }
  0x73   : > { %v311_v52 = vmul.f32 %v616_v38, %v310_v42 }
  0x74   : > { %v326_v53 = vmul.f32 %v618_v39, %v325_v43 }
  0x75   : > { %v312_v56 = vadd.f32 %v616_v38, %v311_v52 }
  0x76   : > { %v327_v58 = vadd.f32 %v618_v39, %v326_v53 }
  0x77   : > { %v316_v62 = vsel %vm315_vm9, %v616_v38, %v312_v56 }
  0x78   : > { %v331_v63 = vsel %vm330_vm10, %v618_v39, %v327_v58  ;;  %v321_v0 = vsel %vm318_vm11, %v320_v60, %v316_v62 }
  0x79   : > { %v336_v1 = vsel %vm333_vm12, %v335_v61, %v331_v63  ;;  %v322_v2 = vmul.f32 %v321_v0, %v867_v44  ;;  %v338_v11 = vmul.f32 %v321_v0, %v871_v46  ;;  %v340_v15 = vmul.f32 %v321_v0, %v875_v48 }
  0x7a   : > { %v337_v3 = vmul.f32 %v336_v1, %v869_v45  ;;  %v339_v44 = vmul.f32 %v336_v1, %v873_v47  ;;  %v342_v17 = vmul.f32 %v321_v0, %v879_v50  ;;  %v343_v18 = vmul.f32 %v336_v1, %v881_v51 }
  0x7b   : > { %v341_v46 = vmul.f32 %v336_v1, %v877_v49 }
  0x7f   : > { %v383_v4 = vpop.permute.xlu2 %382 }
  0x87   : > { %v388_v16 = vpop.permute.xlu2 %387 }
  0x96   : > { %v361_v5 = vpop.permute.xlu1 %360 }
  0x97   : > { %v351_v6 = vpop.permute.xlu0 %350  ;;  %v372_v47 = vmul.f32 %v361_v5, %v340_v15  ;;  %v373_v50 = vmul.f32 %v361_v5, %v341_v46 }
  0x98   : > { %v368_v7 = vmul.f32 %v351_v6, %v322_v2  ;;  %v369_v8 = vmul.f32 %v351_v6, %v337_v3 }
  0x9a   : > { %v400_v9 = vadd.f32 %v383_v4, %v368_v7  ;;  %v401_v10 = vadd.f32 %v383_v4, %v369_v8 }
  0x9c   : > { %408 = vst [vmem:[%s903_s29] sm:$0xff] %v400_v9 }
  0x9d   : > { %409 = vst [vmem:[%s903_s29 + $0x8] sm:$0xff] %v401_v10 }
  0x9e   : > { %v366_v45 = vpop.permute.xlu1 %365 }
  0x9f   : > { %v356_v12 = vpop.permute.xlu0 %355  ;;  %v374_v48 = vmul.f32 %v366_v45, %v342_v17  ;;  %v375_v21 = vmul.f32 %v366_v45, %v343_v18 }
  0xa0   : > { %v370_v13 = vmul.f32 %v356_v12, %v338_v11  ;;  %v371_v14 = vmul.f32 %v356_v12, %v339_v44 }
  0xa2   : > { %v402_v19 = vadd.f32 %v388_v16, %v370_v13  ;;  %v403_v20 = vadd.f32 %v388_v16, %v371_v14 }
  0xa4   : > { %410 = vst [vmem:[%s903_s29 + $0x10] sm:$0xff] %v402_v19 }
  0xa5   : > { %411 = vst [vmem:[%s903_s29 + $0x18] sm:$0xff] %v403_v20 }
  0xa6   : > { %v398_v51 = vpop.permute.xlu1 %397 }
  0xa7   : > { %v393_v22 = vpop.permute.xlu0 %392  ;;  %v406_v49 = vadd.f32 %v398_v51, %v374_v48  ;;  %v407_v23 = vadd.f32 %v398_v51, %v375_v21 }
  0xa8   : > { %v404_v24 = vadd.f32 %v393_v22, %v372_v47  ;;  %v405_v25 = vadd.f32 %v393_v22, %v373_v50 }
  0xa9   : > { %414 = vst [vmem:[%s903_s29 + $0x30] sm:$0xff] %v406_v49 }
  0xaa   : > { %415 = vst [vmem:[%s903_s29 + $0x38] sm:$0xff] %v407_v23 }
  0xab   : > { %412 = vst [vmem:[%s903_s29 + $0x20] sm:$0xff] %v404_v24 }
  0xac   : > { %413 = vst [vmem:[%s903_s29 + $0x28] sm:$0xff] %v405_v25 }
  0xad   : > { %676 = shalt.err (!%p673_p13)
}
  0xae   : > { %s737_s19 = smov 256   ;;  %s738_s22 = smov 16  }
  0xaf   : > { %540 = dma.vmem_to_hbm [thread:$0]  (%p810_p9), %s432_s15, 1024, %s434_s6, %s417_s24, %s737_s19, %s737_s19, %s738_s22  }
  0xb0 PF: > { %s448_s28 = sand.u32 1, %s711_s12   ;;  %p547_p0 = pnand %p524_p12, %p817_p11 }
  0xb1   : > { %s449_s29 = scalar_lea.sflag [#allocation4], %s448_s28 }
  0xb2   : > { %p548_p1 = pneg %p547_p0 }
  0xb4   : > { %706 = dma.done.wait (%p548_p1), %s449_s29, 1024  }
  0xb5   : > { %708 = vsyncadd (%p548_p1), %s449_s29, 4294966272  ;;  %s19_s17 = sadd.s32 1, %s731_s17   ;;  %s966_s12 = smov %s715_s13 }
  0xb6   : > { %p16_p2 = scmp.ge.s32.totalorder %s19_s17, 4   ;;  %s967_s13 = smov %s719_s14 }
  0xb7   : > { %s968_s14 = smov %s815_s26  ;;  %s969_s15 = smov %s727_s16 }
  0xb8   : > { %s970_s16 = smov %s972_s20  ;;  %18 = sbr.rel (!%p16_p2) target bundleno = 6 (0x6), region = 77 }
  0xbd   :  { %455 = vsyncpa [#allocation3], 1 }
  0xbe   :  { %457 = vsyncpa [#allocation3 + $0x1], 1 }
  0xbf   :  { %458 = vsyncpa [#allocation4], 1 }
  0xc0   :  { %460 = vsyncpa [#allocation4 + $0x1], 1 }

</bundles_post_ra>
